<compile_context>
chip_gen: v7x
topology: tpu7x:2x2x1
jax: 0.10.0
libtpu: 0.0.40
codegen_flags: <defaults>
</compile_context>

<pallas_src>
import jax
import jax.numpy as jnp
from jax import lax
from jax.experimental import pallas as pl
from jax.experimental.pallas import tpu as pltpu


def _round_up(x, m):
    return ((x + m - 1) // m) * m


def anet_kernel(x_ref, w_ref, b_ref, o_ref):
    """One row tile of ANet: out = sigmoid(x @ w^T + b), emitted lane-dense.

    x_ref: (tm, F) VMEM  -- row tile of the batch (features along lanes)
    w_ref: (8, F)  VMEM  -- weight row replicated to 8 sublanes (resident)
    b_ref: (1, 1)  SMEM  -- bias scalar
    o_ref: (1, tm) VMEM  -- lane-dense output tile (batch along lanes)
    """
    # Contract the feature dims on the MXU: (8, F) x (tm, F)^T -> (8, tm),
    # all 8 rows identical.  The result is already lane-dense (batch in lanes),
    # so there is no XLU cross-lane reduce and no sublane->lane relayout; the
    # MXU is otherwise completely idle in this kernel.
    z = lax.dot_general(
        w_ref[...], x_ref[...],
        dimension_numbers=(((1,), (1,)), ((), ())),
        preferred_element_type=jnp.float32,
    )
    row = z[0:1, :] + b_ref[0, 0]          # static sublane slice -> (1, tm)
    o_ref[...] = jax.nn.sigmoid(row).astype(o_ref.dtype)


def _vmem_budget():
    """Generation-aware (vmem_limit_bytes, per-x-buffer budget)."""
    cap = 64 * 1024 * 1024                 # conservative (v7x-sized) fallback
    try:
        cap = getattr(pltpu.get_tpu_info(), "vmem_capacity_bytes", cap) or cap
    except Exception:
        pass
    # ~half of physical VMEM as the scoped limit: 64 MiB on v5e/v6e (128 MiB
    # parts), 32 MiB on v7x (64 MiB part).
    limit = max(16 * 1024 * 1024, min(cap // 2, 64 * 1024 * 1024))
    # The x tile is double-buffered by the pipeline; keep headroom for the
    # (tiny) weight/output buffers and Mosaic-internal scratch.
    per_buf = limit // 4
    return limit, per_buf


def _pick_row_tile(batch, features, itemsize, per_buf_bytes,
                   target_bytes_per_step=4 * 1024 * 1024):
    """Row tile size (multiple of 128 lanes for the lane-dense output).

    - HBM floor: each step should move >= target_bytes of real x data so the
      ~0.35 us/step pipeline overhead is amortized (matters most on v7x HBM BW).
    - VMEM ceiling: budgeted with the lane-padded width F_pad = round_up(F,128),
      which is what a (tm, F) block actually occupies in VMEM.
    - Keep >= 2 grid steps when the batch allows, so the "parallel" grid axis
      can feed both v7x TensorCores.
    """
    f_pad = _round_up(features, 128)
    rows_by_vmem = max(128, (per_buf_bytes // (f_pad * itemsize)) // 128 * 128)
    rows_by_traffic = _round_up(
        max(128, pl.cdiv(target_bytes_per_step, features * itemsize)), 128)
    tm = min(rows_by_vmem, rows_by_traffic)
    if batch > 128:
        tm = min(tm, _round_up(pl.cdiv(batch, 2), 128))
    # Balance tiles across the remaining grid steps / limit tail padding.
    num_tiles = pl.cdiv(batch, tm)
    tm = min(tm, _round_up(pl.cdiv(batch, num_tiles), 128))
    return max(128, tm)


def anet_forward(x, weight, bias, *, tm=None, input_dtype=None):
    """ANet forward: sigmoid(nn.Linear(in_feature, 1)(x)).

    x: [B, F]; weight: [1, F] (torch nn.Linear layout) or [F]; bias: [1].
    Returns [B, 1] float32.

    input_dtype: optionally jnp.bfloat16 to halve HBM traffic (the kernel is
    purely HBM-bandwidth-bound); accumulation stays f32 on the MXU.  Default
    float32 matches the PyTorch reference semantics.
    """
    B, F = x.shape
    in_dtype = jnp.dtype(input_dtype) if input_dtype is not None else jnp.dtype(jnp.float32)
    x = x.astype(in_dtype)
    # Replicate the weight row to 8 sublanes so the MXU lhs is a native tile.
    w8 = jnp.broadcast_to(jnp.asarray(weight).reshape(1, F), (8, F)).astype(in_dtype)
    b = jnp.asarray(bias).reshape(1, 1).astype(jnp.float32)

    vmem_limit, per_buf = _vmem_budget()
    if tm is None:
        tm = _pick_row_tile(B, F, in_dtype.itemsize, per_buf)

    # Pad the batch so it divides evenly into row tiles; padded rows are sliced off.
    B_pad = pl.cdiv(B, tm) * tm
    if B_pad != B:
        x = jnp.pad(x, ((0, B_pad - B), (0, 0)))
    grid = (B_pad // tm,)

    cost = pl.CostEstimate(                      # advisory: memory-bound op
        flops=2 * B_pad * F,
        transcendentals=B_pad,
        bytes_accessed=B_pad * F * in_dtype.itemsize
        + 8 * F * in_dtype.itemsize + 4 * B_pad + 4,
    )

    out = pl.pallas_call(
        anet_kernel,
        out_shape=jax.ShapeDtypeStruct((1, B_pad), jnp.float32),
        grid_spec=pltpu.PrefetchScalarGridSpec(
            num_scalar_prefetch=0,
            grid=grid,
            in_specs=[
                pl.BlockSpec((tm, F), lambda i: (i, 0)),            # x row tile
                pl.BlockSpec((8, F), lambda i: (0, 0)),             # weight, resident
                pl.BlockSpec(memory_space=pltpu.MemorySpace.SMEM),  # bias scalar
            ],
            out_specs=pl.BlockSpec((1, tm), lambda i: (0, i)),      # lane-dense output
        ),
        compiler_params=pltpu.CompilerParams(
            dimension_semantics=("parallel",),
            vmem_limit_bytes=vmem_limit,
        ),
        cost_estimate=cost,
    )(x, w8, b)

    return out[0, :B].reshape(B, 1)


if __name__ == "__main__":
    key = jax.random.PRNGKey(0)
    kx1, kw, kb, kx2, kx3 = jax.random.split(key, 5)

    def make_params(k_w, k_b, f):
        # Mimics nn.Linear's uniform(-1/sqrt(F), 1/sqrt(F)) init, deterministically.
        bound = 1.0 / float(f) ** 0.5
        w = jax.random.uniform(k_w, (1, f), minval=-bound, maxval=bound,
                               dtype=jnp.float32)
        b = jax.random.uniform(k_b, (1,), minval=-bound, maxval=bound,
                               dtype=jnp.float32)
        return w, b

    def reference(x, w, b):
        z = jnp.dot(x, w.T, precision=jax.lax.Precision.HIGHEST) + b
        return jax.nn.sigmoid(z)

    # 1) Tiny batch (single grid step, heavy row padding).
    B1, F1 = 8, 32
    x1 = jax.random.normal(kx1, (B1, F1), dtype=jnp.float32)
    w1, b1 = make_params(kw, kb, F1)
    out1 = jax.block_until_ready(anet_forward(x1, w1, b1))
    assert out1.shape == (B1, 1)
    # The MXU f32 contraction may use bf16 passes depending on generation /
    # default matmul precision; tolerance covers that worst case.
    assert jnp.allclose(out1, reference(x1, w1, b1), atol=5e-3, rtol=0)

    # 2) Batch not a multiple of the tile, odd feature count, multi-step grid.
    B2, F2 = 300, 96
    x2 = jax.random.normal(kx2, (B2, F2), dtype=jnp.float32)
    w2, b2 = make_params(kw, kb, F2)
    out2 = jax.block_until_ready(anet_forward(x2, w2, b2))
    assert out2.shape == (B2, 1)
    assert jnp.allclose(out2, reference(x2, w2, b2), atol=5e-3, rtol=0)

    # 3) bf16 input path (halves HBM bytes; f32 MXU accumulation).
    B3, F3 = 256, 64
    x3 = jax.random.normal(kx3, (B3, F3), dtype=jnp.float32)
    w3, b3 = make_params(kw, kb, F3)
    out3 = jax.block_until_ready(anet_forward(x3, w3, b3, input_dtype=jnp.bfloat16))
    assert out3.shape == (B3, 1)
    assert jnp.allclose(out3, reference(x3, w3, b3), atol=2e-2, rtol=0)

    print("KERNEL_OK")
</pallas_src>

<mosaic_0001>
module attributes {stable_mosaic.version = 11 : i64} {
  func.func @anet_kernel(%arg0: i32, %arg1: memref<128x32xf32, #tpu.memory_space<vmem>>, %arg2: memref<8x32xf32, #tpu.memory_space<vmem>>, %arg3: memref<1x1xf32, #tpu.memory_space<smem>>, %arg4: memref<1x128xf32, #tpu.memory_space<vmem>>) attributes {dimension_semantics = [#tpu.dimension_semantics<parallel>], iteration_bounds = array<i64: 1>, scalar_prefetch = 0 : i64, scratch_operands = 0 : i64, tpu.core_type = #tpu.core_type<tc>, window_params = [{transform_indices = @transform_0, window_bounds = array<i64: 128, 32>}, {pipeline_mode = #tpu.pipeline_mode<synchronous>, transform_indices = @transform_1, window_bounds = array<i64: 8, 32>}, {transform_indices = @transform_2, window_bounds = array<i64: 1, 1>}, {transform_indices = @transform_3, window_bounds = array<i64: 1, 128>}]} {
    %c0 = arith.constant 0 : index
    %c0_0 = arith.constant 0 : index
    %0 = vector.load %arg2[%c0, %c0_0] : memref<8x32xf32, #tpu.memory_space<vmem>>, vector<8x32xf32>
    %c0_1 = arith.constant 0 : index
    %c0_2 = arith.constant 0 : index
    %1 = vector.load %arg1[%c0_1, %c0_2] : memref<128x32xf32, #tpu.memory_space<vmem>>, vector<128x32xf32>
    %cst = arith.constant dense<0.000000e+00> : vector<8x128xf32>
    %2 = tpu.matmul %0, %1, %cst {dimension_numbers = #tpu.dot_dimension_numbers<[1], [1], [0], [0], [0, 0, 1, 0], [], []>} : vector<8x32xf32>, vector<128x32xf32>, vector<8x128xf32> -> vector<8x128xf32>
    %3 = vector.extract_strided_slice %2 {offsets = [0, 0], sizes = [1, 128], strides = [1, 1]} : vector<8x128xf32> to vector<1x128xf32>
    %c0_3 = arith.constant 0 : index
    %c0_4 = arith.constant 0 : index
    %4 = memref.load %arg3[%c0_3, %c0_4] : memref<1x1xf32, #tpu.memory_space<smem>>
    %5 = vector.broadcast %4 : f32 to vector<1x128xf32>
    %6 = arith.addf %3, %5 : vector<1x128xf32>
    %7 = arith.negf %6 : vector<1x128xf32>
    %8 = math.exp %7 : vector<1x128xf32>
    %cst_5 = arith.constant 1.000000e+00 : f32
    %9 = vector.broadcast %cst_5 : f32 to vector<1x128xf32>
    %10 = arith.addf %9, %8 : vector<1x128xf32>
    %11 = arith.divf %9, %10 : vector<1x128xf32>
    %c0_6 = arith.constant 0 : index
    %c0_7 = arith.constant 0 : index
    %12 = vector.load %arg4[%c0_6, %c0_7] : memref<1x128xf32, #tpu.memory_space<vmem>>, vector<1x128xf32>
    tpu.vector_store %arg4[%c0_6, %c0_7], %11 {strides = array<i32>} : memref<1x128xf32, #tpu.memory_space<vmem>>, vector<1x128xf32>,
    return
  }
  func.func @transform_0(%arg0: i32) -> (i32, i32) {
    %c0_i32 = arith.constant 0 : i32
    %c0_i32_0 = arith.constant 0 : i32
    return %arg0, %c0_i32 : i32, i32
  }
  func.func @transform_1(%arg0: i32) -> (i32, i32) {
    %c0_i32 = arith.constant 0 : i32
    %c0_i32_0 = arith.constant 0 : i32
    %c0_i32_1 = arith.constant 0 : i32
    return %c0_i32, %c0_i32_0 : i32, i32
  }
  func.func @transform_2(%arg0: i32) -> (i32, i32) {
    %c0_i32 = arith.constant 0 : i32
    %c0_i32_0 = arith.constant 0 : i32
    %c0_i32_1 = arith.constant 0 : i32
    return %c0_i32, %c0_i32_0 : i32, i32
  }
  func.func @transform_3(%arg0: i32) -> (i32, i32) {
    %c0_i32 = arith.constant 0 : i32
    %c0_i32_0 = arith.constant 0 : i32
    return %c0_i32, %arg0 : i32, i32
  }
}

</mosaic_0001>

<bundles_post_ra>
// kernel: tpu_custom_call.1
= control target key start
LH: loop header
LB: loop body
LE: loop exit
PB: predicated region body
PF: predicated region fallthrough
CT: control target
= control target key end

     0   :  { %vm33_vm0 = vcmask 261120   ;;  %v313_v2 = vmov 0.0|0.0   ;;  %vm314_vm2 = vmmov 0   ;;  %v315_v5 = vmov 0.0   ;;  %s426_s0 = inlined_call_operand.vmem [shape: f32[128,32], index: 0, kind: input, shape index: {}]   ;;  %s427_s1 = inlined_call_operand.vmem [shape: f32[8,32], index: 1, kind: input, shape index: {}]   ;;  %s428_s2 = inlined_call_operand.<no memory space> [shape: f32[1,1], index: 2, kind: input, shape index: {}]   ;;  %s429_s3 = inlined_call_operand.hbm [shape: f32[1,128], index: 3, kind: output, shape index: {}]  }
   0x1   :  { %v17_v0 = vld [vmem:[%s426_s0] sm:$0xff]  ;;  %v18_v1 = vld [vmem:[%s426_s0 + $0x8] sm:$0xff]  ;;  %249 = vmatprep.subr.bf16.mxu0 %v313_v2  ;;  %vm345_vm1 = vmpackc.low %vm33_vm0, %vm33_vm0  ;;  %246 = vmatprep.mubr.msk.f32.mxu0 %vm314_vm2, %v315_v5 }
   0x2   :  { %v250_v3 = vpack.c.bf16 %v18_v1, %v17_v0  ;;  %v19_v6 = vld [vmem:[%s426_s0 + $0x10] sm:$0xff]  ;;  %v20_v7 = vld [vmem:[%s426_s0 + $0x18] sm:$0xff] }
   0x4   :  { %252 = vmatpush3.bf16.xpose.msk.msra.mxu0 %vm345_vm1, %v250_v3 }
   0x5   :  { %253 = vmatprep.subr.bf16.mxu0 %v313_v2 }
   0x6   :  { %9 = vsyncpa [#allocation4], 0  ;;  %v254_v8 = vpack.c.bf16 %v20_v7, %v19_v6  ;;  %v21_v9 = vld [vmem:[%s426_s0 + $0x20] sm:$0xff]  ;;  %v22_v10 = vld [vmem:[%s426_s0 + $0x28] sm:$0xff]  ;;  %v156_v28 = vstv %s428_s2 }
   0x7   :  { %v258_v11 = vpack.c.bf16 %v22_v10, %v21_v9  ;;  %v23_v12 = vld [vmem:[%s426_s0 + $0x30] sm:$0xff]  ;;  %v24_v13 = vld [vmem:[%s426_s0 + $0x38] sm:$0xff]  ;;  %v25_v15 = vld [vmem:[%s426_s0 + $0x40] sm:$0xff] }
   0x8   :  { %v262_v14 = vpack.c.bf16 %v24_v13, %v23_v12  ;;  %v26_v16 = vld [vmem:[%s426_s0 + $0x48] sm:$0xff]  ;;  %v27_v18 = vld [vmem:[%s426_s0 + $0x50] sm:$0xff]  ;;  %v28_v19 = vld [vmem:[%s426_s0 + $0x58] sm:$0xff] }
   0x9   :  { %v266_v17 = vpack.c.bf16 %v26_v16, %v25_v15  ;;  %v270_v20 = vpack.c.bf16 %v28_v19, %v27_v18  ;;  %v29_v21 = vld [vmem:[%s426_s0 + $0x60] sm:$0xff]  ;;  %v30_v22 = vld [vmem:[%s426_s0 + $0x68] sm:$0xff]  ;;  %v31_v24 = vld [vmem:[%s426_s0 + $0x70] sm:$0xff] }
   0xa   :  { %v274_v23 = vpack.c.bf16 %v30_v22, %v29_v21  ;;  %v32_v25 = vld [vmem:[%s426_s0 + $0x78] sm:$0xff]  ;;  %v16_v27 = vld [vmem:[%s427_s1] sm:$0xff]  ;;  %s316_s0 = smov [#allocation3]  }
   0xb   :  { %v278_v26 = vpack.c.bf16 %v32_v25, %v31_v24  ;;  %s171_s21 = sshll.u32 %s316_s0, 4  ;;  %s172_s21 = int_to_ptr.vmem [resolvable:$true] %s171_s21 }
   0xc   :  { %256 = vmatpush3.bf16.xpose.msk.msra.mxu0 %vm345_vm1, %v254_v8  ;;  %s289_s1 = scalar_lea.vmem %s172_s21, 16  ;;  %s293_s22 = scalar_lea.vmem %s172_s21, 32 }
   0xd   :  { %257 = vmatprep.subr.bf16.mxu0 %v313_v2  ;;  %p290_p0 = scmp.ne.s32.totalorder %s172_s21, %s289_s1  ;;  %p294_p1 = scmp.lt.s32.totalorder %s172_s21, %s172_s21 }
   0xe   :  { %p295_p2 = scmp.lt.s32.totalorder %s293_s22, %s289_s1 }
  0x10   :  { %p296_p3 = por %p295_p2, %p294_p1 }
  0x12   :  { %p297_p4 = pnand %p296_p3, %p290_p0 }
  0x14   :  { %260 = vmatpush3.bf16.xpose.msk.msra.mxu0 %vm345_vm1, %v258_v11 }
  0x15   :  { %261 = vmatprep.subr.bf16.mxu0 %v313_v2 }
  0x1c   :  { %264 = vmatpush3.bf16.xpose.msk.msra.mxu0 %vm345_vm1, %v262_v14 }
  0x1d   :  { %265 = vmatprep.subr.bf16.mxu0 %v313_v2 }
  0x24   :  { %268 = vmatpush3.bf16.xpose.msk.msra.mxu0 %vm345_vm1, %v266_v17 }
  0x25   :  { %269 = vmatprep.subr.bf16.mxu0 %v313_v2 }
  0x2c   :  { %272 = vmatpush3.bf16.xpose.msk.msra.mxu0 %vm345_vm1, %v270_v20 }
  0x2d   :  { %273 = vmatprep.subr.bf16.mxu0 %v313_v2 }
  0x34   :  { %276 = vmatpush3.bf16.xpose.msk.msra.mxu0 %vm345_vm1, %v274_v23 }
  0x35   :  { %277 = vmatprep.subr.bf16.mxu0 %v313_v2 }
  0x3c   :  { %280 = vmatpush3.bf16.xpose.msk.msra.mxu0 %vm345_vm1, %v278_v26 }
  0x43   :  { %247 = vmatmul.mubr.msk.f32.vlgmr.msra.gmra.mrb[0].mxu0 %vm33_vm0, %v16_v27 }
 0x116   :  { %v151_v29 = vpop.f32.mrb[0].mxu0 }
 0x117   :  { %v157_v30 = vadd.f32 %v156_v28, %v151_v29  ;;  %v248_v31 = vpop.f32.mrb[1].mxu0 }
 0x119   :  { %v196_v32 = vmul.f32 -1.442695, %v157_v30 }
 0x11b   :  { %285 = vpow2.f32 %v196_v32 }
 0x125   :  { %v286_v33 = vpop.eup %285 }
 0x126   :  { %v161_v34 = vadd.f32 1.0, %v286_v33 }
 0x128   :  { %287 = vrcp.f32 %v161_v34 }
 0x132   :  { %v288_v35 = vpop.eup %287 }
 0x133   :  { %164 = vst [vmem:[#allocation3] sm:$0x1] %v288_v35 }
 0x134   :  { %300 = shalt.err (!%p297_p4)
}
 0x135   :  { %s301_s24 = scalar_lea.hbm %s429_s3, 16 }
 0x136   :  { %p302_p5 = scmp.ne.s32.totalorder %s429_s3, %s301_s24  ;;  %p305_p6 = scmp.lt.u32.totalorder %s301_s24, %s429_s3 }
 0x138   :  { %p307_p7 = pnand %p305_p6, %p302_p5 }
 0x13a   :  { %310 = shalt.err (!%p307_p7)
}
 0x13b   :  { %174 = dma.vmem_to_hbm [thread:$0]  %s172_s21, 16, %s429_s3, [#allocation4]  }
 0x13c   :  { %311 = dma.done.wait [#allocation4], 16  }
 0x13d   :  { %312 = vsyncadd [#allocation4], 4294967280 }
 0x13e   :  { %178 = vsyncpa [#allocation4], 1 }

</bundles_post_ra>
